<compile_context>
chip_gen: v7x
topology: tpu7x:2x2x1
jax: 0.10.0
libtpu: 0.0.40
codegen_flags: <defaults>
</compile_context>

<pallas_src>
import functools
import math

import jax
import jax.numpy as jnp
from jax.experimental import pallas as pl
from jax.experimental.pallas import tpu as pltpu

_LANES = 128
_SUBLANES = 8
_MAX_TILE_ROWS = 2048   # (2048, 128) f32 block = 1 MiB per input per block
_IGNORE = 255.0


def _masked_l1_kernel(pred_ref, lab_ref, sum_ref, cnt_ref, *,
                      tile_rows, rows, steps_per_shard, needs_row_mask):
    k = pl.program_id(1)

    @pl.when(k == 0)
    def _():
        sum_ref[...] = jnp.zeros_like(sum_ref)
        cnt_ref[...] = jnp.zeros_like(cnt_ref)

    x = pred_ref[...].astype(jnp.float32)
    y = lab_ref[...].astype(jnp.float32)
    valid = y != _IGNORE
    if needs_row_mask:
        # Intended (unclamped) tile index; rows beyond `rows` (partial edge
        # tiles and dummy steps of the sharded grid) are masked out here.
        t = pl.program_id(0) * steps_per_shard + k
        gid = t * tile_rows + jax.lax.broadcasted_iota(
            jnp.int32, (tile_rows, _LANES), 0)
        valid = valid & (gid < rows)

    # Select form (never multiply): garbage/NaN in masked lanes cannot leak.
    absdiff = jnp.where(valid, jnp.abs(x - y), 0.0)
    cnt = valid.astype(jnp.float32)

    # Tile-aligned free view + pure-VALU partial reduce, then a single
    # vreg-sized (8,128) read-modify-write into the resident output block.
    m = tile_rows // _SUBLANES
    sum_ref[0] += absdiff.reshape(m, _SUBLANES, _LANES).sum(axis=0)
    cnt_ref[0] += cnt.reshape(m, _SUBLANES, _LANES).sum(axis=0)


def depth_loss(out, label):
    """Equivalent of DepthLoss('l1').forward(out, label)."""
    assert out.shape == label.shape
    n = math.prod(out.shape)

    pred_flat = jnp.reshape(out, (n,))     # contiguous reshape: no copy
    lab_flat = jnp.reshape(label, (n,))

    n_main = (n // (_SUBLANES * _LANES)) * (_SUBLANES * _LANES)
    tail = n - n_main

    tail_sum = jnp.float32(0.0)
    tail_cnt = jnp.float32(0.0)
    if tail:
        # TODO(synk): when n is not a multiple of 1024 the prefix slice below may
        # force an HBM copy; the <1024-element tail itself is trivially cheap.
        tp = pred_flat[n_main:].astype(jnp.float32)
        tl = lab_flat[n_main:].astype(jnp.float32)
        tv = tl != _IGNORE
        tail_sum = jnp.sum(jnp.where(tv, jnp.abs(tp - tl), 0.0))
        tail_cnt = jnp.sum(tv.astype(jnp.float32))

    if n_main == 0:
        return tail_sum / tail_cnt

    rows = n_main // _LANES                # multiple of 8 by construction
    pred2d = jnp.reshape(pred_flat[:n_main] if tail else pred_flat, (rows, _LANES))
    lab2d = jnp.reshape(lab_flat[:n_main] if tail else lab_flat, (rows, _LANES))

    tile_rows = min(_MAX_TILE_ROWS, rows)
    steps_total = pl.cdiv(rows, tile_rows)
    num_shards = 2 if steps_total >= 2 else 1   # v7x: 2 TCs; harmless on v5e/v6e
    steps_per_shard = pl.cdiv(steps_total, num_shards)
    needs_row_mask = num_shards * steps_per_shard * tile_rows != rows

    def in_map(s, k):
        # Clamp so dummy steps (odd steps_total split over 2 shards) re-read the
        # last real tile; the in-kernel row mask zeroes their contribution.
        return (jnp.minimum(s * steps_per_shard + k, steps_total - 1), 0)

    in_spec = pl.BlockSpec((tile_rows, _LANES), in_map)
    acc_spec = pl.BlockSpec((1, _SUBLANES, _LANES), lambda s, k: (s, 0, 0))

    kernel = functools.partial(
        _masked_l1_kernel, tile_rows=tile_rows, rows=rows,
        steps_per_shard=steps_per_shard, needs_row_mask=needs_row_mask)

    sums, cnts = pl.pallas_call(
        kernel,
        out_shape=(
            jax.ShapeDtypeStruct((num_shards, _SUBLANES, _LANES), jnp.float32),
            jax.ShapeDtypeStruct((num_shards, _SUBLANES, _LANES), jnp.float32),
        ),
        grid_spec=pltpu.PrefetchScalarGridSpec(
            num_scalar_prefetch=0,
            grid=(num_shards, steps_per_shard),
            in_specs=[in_spec, in_spec],
            out_specs=[acc_spec, acc_spec],
        ),
        compiler_params=pltpu.CompilerParams(
            dimension_semantics=("parallel", "arbitrary"),
        ),
        cost_estimate=pl.CostEstimate(
            flops=6 * n_main,
            transcendentals=0,
            bytes_accessed=(n_main * (pred2d.dtype.itemsize + lab2d.dtype.itemsize)
                            + 2 * num_shards * _SUBLANES * _LANES * 4),
        ),
    )(pred2d, lab2d)

    total = jnp.sum(sums) + tail_sum
    count = jnp.sum(cnts) + tail_cnt
    # NOTE: zero valid pixels -> 0/0 = NaN, matching masked_select + mean-of-empty.
    return total / count


def _reference(out, label):
    x = out.astype(jnp.float32)
    y = label.astype(jnp.float32)
    m = y != _IGNORE
    return jnp.sum(jnp.where(m, jnp.abs(x - y), 0.0)) / jnp.sum(m.astype(jnp.float32))


if __name__ == "__main__":
    key = jax.random.PRNGKey(0)
    ks = jax.random.split(key, 12)

    def make_case(kp, kl, km, shape, frac_ignored, dtype=jnp.float32):
        pred = jax.random.uniform(kp, shape, jnp.float32, 0.0, 10.0).astype(dtype)
        lab = jax.random.uniform(kl, shape, jnp.float32, 0.0, 10.0).astype(dtype)
        ign = jax.random.uniform(km, shape) > (1.0 - frac_ignored)
        lab = jnp.where(ign, jnp.asarray(_IGNORE, dtype), lab)
        return pred, lab

    cases = [
        # Small single-block case (2048 elems -> 16 rows, 1 tile).
        make_case(ks[0], ks[1], ks[2], (2, 1, 32, 32), 0.3),
        # Multi-tile: 5120 rows -> 3 tiles over 2 shards (dummy step + partial
        # edge tile, both handled by the in-kernel row mask).
        make_case(ks[3], ks[4], ks[5], (2, 1, 512, 640), 0.1),
        # Element count not a multiple of 1024 -> wrapper jnp tail path.
        make_case(ks[6], ks[7], ks[8], (2, 1, 37, 53), 0.2),
        # bf16 inputs streamed at native width (half the HBM bytes).
        make_case(ks[9], ks[10], ks[11], (2, 1, 64, 128), 0.25, jnp.bfloat16),
    ]

    for pred, lab in cases:
        got = jax.block_until_ready(depth_loss(pred, lab))
        ref = _reference(pred, lab)
        assert jnp.allclose(got, ref, rtol=1e-4, atol=1e-5), (pred.shape, got, ref)

    print("KERNEL_OK")
</pallas_src>

<mosaic_0001>
module attributes {stable_mosaic.version = 11 : i64} {
  func.func @_masked_l1_kernel(%arg0: i32, %arg1: i32, %arg2: memref<16x128xf32, #tpu.memory_space<vmem>>, %arg3: memref<16x128xf32, #tpu.memory_space<vmem>>, %arg4: memref<1x8x128xf32, #tpu.memory_space<vmem>>, %arg5: memref<1x8x128xf32, #tpu.memory_space<vmem>>) attributes {dimension_semantics = [#tpu.dimension_semantics<parallel>, #tpu.dimension_semantics<arbitrary>], iteration_bounds = array<i64: 1, 1>, scalar_prefetch = 0 : i64, scratch_operands = 0 : i64, tpu.core_type = #tpu.core_type<tc>, window_params = [{transform_indices = @transform_0, window_bounds = array<i64: 16, 128>}, {transform_indices = @transform_1, window_bounds = array<i64: 16, 128>}, {transform_indices = @transform_2, window_bounds = array<i64: 1, 8, 128>}, {transform_indices = @transform_3, window_bounds = array<i64: 1, 8, 128>}]} {
    %c0_i32 = arith.constant 0 : i32
    %0 = arith.cmpi eq, %arg1, %c0_i32 : i32
    %1 = arith.extui %0 : i1 to i32
    %c0_i32_0 = arith.constant 0 : i32
    %2 = arith.cmpi ne, %1, %c0_i32_0 : i32
    scf.if %2 {
      %cst_19 = arith.constant 0.000000e+00 : f32
      %29 = vector.broadcast %cst_19 : f32 to vector<1x8x128xf32>
      %c0_20 = arith.constant 0 : index
      %c0_21 = arith.constant 0 : index
      %c0_22 = arith.constant 0 : index
      %30 = vector.load %arg4[%c0_20, %c0_21, %c0_22] : memref<1x8x128xf32, #tpu.memory_space<vmem>>, vector<1x8x128xf32>
      tpu.vector_store %arg4[%c0_20, %c0_21, %c0_22], %29 {strides = array<i32>} : memref<1x8x128xf32, #tpu.memory_space<vmem>>, vector<1x8x128xf32>,
      %cst_23 = arith.constant 0.000000e+00 : f32
      %31 = vector.broadcast %cst_23 : f32 to vector<1x8x128xf32>
      %c0_24 = arith.constant 0 : index
      %c0_25 = arith.constant 0 : index
      %c0_26 = arith.constant 0 : index
      %32 = vector.load %arg5[%c0_24, %c0_25, %c0_26] : memref<1x8x128xf32, #tpu.memory_space<vmem>>, vector<1x8x128xf32>
      tpu.vector_store %arg5[%c0_24, %c0_25, %c0_26], %31 {strides = array<i32>} : memref<1x8x128xf32, #tpu.memory_space<vmem>>, vector<1x8x128xf32>,
    } else {
    }
    %c0 = arith.constant 0 : index
    %c0_1 = arith.constant 0 : index
    %3 = vector.load %arg2[%c0, %c0_1] : memref<16x128xf32, #tpu.memory_space<vmem>>, vector<16x128xf32>
    %c0_2 = arith.constant 0 : index
    %c0_3 = arith.constant 0 : index
    %4 = vector.load %arg3[%c0_2, %c0_3] : memref<16x128xf32, #tpu.memory_space<vmem>>, vector<16x128xf32>
    %cst = arith.constant 2.550000e+02 : f32
    %5 = vector.broadcast %cst : f32 to vector<16x128xf32>
    %6 = arith.cmpf one, %4, %5 : vector<16x128xf32>
    %7 = arith.subf %3, %4 : vector<16x128xf32>
    %8 = math.absf %7 : vector<16x128xf32>
    %cst_4 = arith.constant 0.000000e+00 : f32
    %9 = vector.broadcast %cst_4 : f32 to vector<16x128xf32>
    %10 = arith.select %6, %8, %9 : vector<16x128xi1>, vector<16x128xf32>
    %11 = arith.extui %6 : vector<16x128xi1> to vector<16x128xi32>
    %12 = arith.sitofp %11 : vector<16x128xi32> to vector<16x128xf32>
    %c0_5 = arith.constant 0 : index
    %c0_6 = arith.constant 0 : index
    %c0_7 = arith.constant 0 : index
    %13 = vector.load %arg4[%c0_5, %c0_6, %c0_7] : memref<1x8x128xf32, #tpu.memory_space<vmem>>, vector<1x8x128xf32>
    %14 = vector.shape_cast %13 : vector<1x8x128xf32> to vector<8x128xf32>
    %15 = vector.shape_cast %10 : vector<16x128xf32> to vector<2x8x128xf32>
    %cst_8 = arith.constant dense<0.000000e+00> : vector<8x128xf32>
    %16 = vector.multi_reduction <add>, %15, %cst_8 [0] : vector<2x8x128xf32> to vector<8x128xf32>
    %17 = arith.addf %14, %16 : vector<8x128xf32>
    %c0_9 = arith.constant 0 : index
    %c0_10 = arith.constant 0 : index
    %c0_11 = arith.constant 0 : index
    %18 = vector.load %arg4[%c0_9, %c0_10, %c0_11] : memref<1x8x128xf32, #tpu.memory_space<vmem>>, vector<1x8x128xf32>
    %19 = vector.shape_cast %18 : vector<1x8x128xf32> to vector<8x128xf32>
    %20 = vector.shape_cast %17 : vector<8x128xf32> to vector<1x8x128xf32>
    tpu.vector_store %arg4[%c0_9, %c0_10, %c0_11], %20 {strides = array<i32>} : memref<1x8x128xf32, #tpu.memory_space<vmem>>, vector<1x8x128xf32>,
    %c0_12 = arith.constant 0 : index
    %c0_13 = arith.constant 0 : index
    %c0_14 = arith.constant 0 : index
    %21 = vector.load %arg5[%c0_12, %c0_13, %c0_14] : memref<1x8x128xf32, #tpu.memory_space<vmem>>, vector<1x8x128xf32>
    %22 = vector.shape_cast %21 : vector<1x8x128xf32> to vector<8x128xf32>
    %23 = vector.shape_cast %12 : vector<16x128xf32> to vector<2x8x128xf32>
    %cst_15 = arith.constant dense<0.000000e+00> : vector<8x128xf32>
    %24 = vector.multi_reduction <add>, %23, %cst_15 [0] : vector<2x8x128xf32> to vector<8x128xf32>
    %25 = arith.addf %22, %24 : vector<8x128xf32>
    %c0_16 = arith.constant 0 : index
    %c0_17 = arith.constant 0 : index
    %c0_18 = arith.constant 0 : index
    %26 = vector.load %arg5[%c0_16, %c0_17, %c0_18] : memref<1x8x128xf32, #tpu.memory_space<vmem>>, vector<1x8x128xf32>
    %27 = vector.shape_cast %26 : vector<1x8x128xf32> to vector<8x128xf32>
    %28 = vector.shape_cast %25 : vector<8x128xf32> to vector<1x8x128xf32>
    tpu.vector_store %arg5[%c0_16, %c0_17, %c0_18], %28 {strides = array<i32>} : memref<1x8x128xf32, #tpu.memory_space<vmem>>, vector<1x8x128xf32>,
    return
  }
  func.func @transform_0(%arg0: i32, %arg1: i32) -> (i32, i32) {
    %c1_i32 = arith.constant 1 : i32
    %0 = arith.muli %arg0, %c1_i32 : i32
    %1 = arith.addi %0, %arg1 : i32
    %c0_i32 = arith.constant 0 : i32
    %2 = arith.minsi %1, %c0_i32 : i32
    %c0_i32_0 = arith.constant 0 : i32
    %c0_i32_1 = arith.constant 0 : i32
    return %2, %c0_i32_0 : i32, i32
  }
  func.func @transform_1(%arg0: i32, %arg1: i32) -> (i32, i32) {
    %c1_i32 = arith.constant 1 : i32
    %0 = arith.muli %arg0, %c1_i32 : i32
    %1 = arith.addi %0, %arg1 : i32
    %c0_i32 = arith.constant 0 : i32
    %2 = arith.minsi %1, %c0_i32 : i32
    %c0_i32_0 = arith.constant 0 : i32
    %c0_i32_1 = arith.constant 0 : i32
    return %2, %c0_i32_0 : i32, i32
  }
  func.func @transform_2(%arg0: i32, %arg1: i32) -> (i32, i32, i32) {
    %c0_i32 = arith.constant 0 : i32
    %c0_i32_0 = arith.constant 0 : i32
    %c0_i32_1 = arith.constant 0 : i32
    return %arg0, %c0_i32, %c0_i32_0 : i32, i32, i32
  }
  func.func @transform_3(%arg0: i32, %arg1: i32) -> (i32, i32, i32) {
    %c0_i32 = arith.constant 0 : i32
    %c0_i32_0 = arith.constant 0 : i32
    %c0_i32_1 = arith.constant 0 : i32
    return %arg0, %c0_i32, %c0_i32_0 : i32, i32, i32
  }
}

</mosaic_0001>

<bundles_post_ra>
// kernel: tpu_custom_call.1
= control target key start
LH: loop header
LB: loop body
LE: loop exit
PB: predicated region body
PF: predicated region fallthrough
CT: control target
= control target key end

     0   :  { %9 = vsyncpa [#allocation3], 0  ;;  %s307_s0 = inlined_call_operand.hbm [shape: f32[16,128], index: 0, kind: input, shape index: {}]   ;;  %s308_s1 = inlined_call_operand.hbm [shape: f32[16,128], index: 1, kind: input, shape index: {}]   ;;  %s309_s2 = inlined_call_operand.hbm [shape: f32[1,8,128], index: 2, kind: output, shape index: {0}]   ;;  %s310_s3 = inlined_call_operand.hbm [shape: f32[1,8,128], index: 3, kind: output, shape index: {1}]  }
   0x1   :  { %10 = vsyncpa [#allocation6], 0 }
   0x2   :  { %11 = vsyncpa [#allocation4], 0 }
   0x3   :  { %12 = vsyncpa [#allocation9], 0  ;;  %s232_s12 = smov [#allocation2]   ;;  %s136_s16 = scalar_lea.hbm %s307_s0, 256 }
   0x4   :  { %s24_s13 = sshll.u32 %s232_s12, 4  ;;  %p137_p0 = scmp.ne.s32.totalorder %s307_s0, %s136_s16  ;;  %s25_s13 = int_to_ptr.vmem [resolvable:$true] %s24_s13 }
   0x5   :  { %p140_p1 = scmp.lt.u32.totalorder %s136_s16, %s307_s0 }
   0x7   :  { %p142_p2 = pnand %p140_p1, %p137_p0 }
   0x9   :  { %145 = shalt.err (!%p142_p2)
}
   0xa   :  { %s146_s21 = scalar_lea.vmem %s25_s13, 256  ;;  %p151_p4 = scmp.lt.s32.totalorder %s25_s13, %s25_s13 }
   0xb   :  { %p147_p3 = scmp.ne.s32.totalorder %s25_s13, %s146_s21  ;;  %p152_p5 = scmp.lt.s32.totalorder %s146_s21, %s146_s21 }
   0xd   :  { %p153_p6 = por %p152_p5, %p151_p4 }
   0xf   :  { %p154_p7 = pnand %p153_p6, %p147_p3 }
  0x11   :  { %157 = shalt.err (!%p154_p7)
}
  0x12   :  { %s233_s22 = smov 128   ;;  %s234_s23 = smov 8  }
  0x13   :  { %30 = dma.hbm_to_vmem [thread:$0]  %s307_s0, 256, %s25_s13, [#allocation3], %s233_s22, %s233_s22, %s234_s23  }
  0x14   :  { %s235_s26 = smov [#allocation5]   ;;  %s158_s30 = scalar_lea.hbm %s308_s1, 256 }
  0x15   :  { %s42_s27 = sshll.u32 %s235_s26, 4  ;;  %p159_p8 = scmp.ne.s32.totalorder %s308_s1, %s158_s30  ;;  %s43_s27 = int_to_ptr.vmem [resolvable:$true] %s42_s27 }
  0x16   :  { %p162_p9 = scmp.lt.u32.totalorder %s158_s30, %s308_s1 }
  0x18   :  { %p164_p10 = pnand %p162_p9, %p159_p8 }
  0x1a   :  { %167 = shalt.err (!%p164_p10)
}
  0x1b   :  { %s168_s8 = scalar_lea.vmem %s43_s27, 256  ;;  %p173_p12 = scmp.lt.s32.totalorder %s43_s27, %s43_s27 }
  0x1c   :  { %p169_p11 = scmp.ne.s32.totalorder %s43_s27, %s168_s8  ;;  %p174_p13 = scmp.lt.s32.totalorder %s168_s8, %s168_s8 }
  0x1e   :  { %p175_p0 = por %p174_p13, %p173_p12 }
  0x20   :  { %p176_p1 = pnand %p175_p0, %p169_p11 }
  0x22   :  { %179 = shalt.err (!%p176_p1)
}
  0x23   :  { %48 = dma.hbm_to_vmem [thread:$0]  %s308_s1, 256, %s43_s27, [#allocation6], %s233_s22, %s233_s22, %s234_s23  }
  0x24   :  { %224 = dma.done.wait [#allocation3], 256  }
  0x25   :  { %225 = vsyncadd [#allocation3], 4294967040 }
  0x26   :  { %226 = dma.done.wait [#allocation6], 256  }
  0x27   :  { %227 = vsyncadd [#allocation6], 4294967040  ;;  %v69_v0 = vld [vmem:[#allocation2] sm:$0xff]  ;;  %v70_v1 = vld [vmem:[#allocation2 + $0x8] sm:$0xff]  ;;  %v236_v6 = vmov 0.0   ;;  %s237_s10 = smov [#allocation8]  }
  0x28   :  { %v71_v2 = vld [vmem:[#allocation5] sm:$0xff]  ;;  %v72_v3 = vld [vmem:[#allocation5 + $0x8] sm:$0xff]  ;;  %s109_s11 = sshll.u32 %s237_s10, 4  ;;  %s238_s1 = smov [#allocation7]   ;;  %s110_s11 = int_to_ptr.vmem [resolvable:$true] %s109_s11 }
  0x29   :  { %vm73_vm0 = vcmp.ne.f32.partialorder %v71_v2, 255.0  ;;  %v75_v4 = vsub.f32 %v69_v0, %v71_v2  ;;  %vm74_vm1 = vcmp.ne.f32.partialorder %v72_v3, 255.0  ;;  %v76_v5 = vsub.f32 %v70_v1, %v72_v3  ;;  %s99_s12 = sshll.u32 %s238_s1, 4  ;;  %s180_s13 = scalar_lea.vmem %s110_s11, 128  ;;  %s100_s12 = int_to_ptr.vmem [resolvable:$true] %s99_s12 }
  0x2a   :  { %v127_v7 = vsel %vm73_vm0, 1.0, %v236_v6  ;;  %v128_v9 = vsel %vm74_vm1, 1.0, %v236_v6  ;;  %p181_p2 = scmp.ne.s32.totalorder %s110_s11, %s180_s13  ;;  %p185_p3 = scmp.lt.s32.totalorder %s110_s11, %s110_s11 }
  0x2b   :  { %v77_v8 = vand.u32 2147483647, %v75_v4  ;;  %v78_v10 = vand.u32 2147483647, %v76_v5  ;;  %v90_v11 = vadd.f32 %v128_v9, %v127_v7  ;;  %p186_p4 = scmp.lt.s32.totalorder %s180_s13, %s180_s13 }
  0x2d   :  { %v79_v12 = vsel %vm73_vm0, %v77_v8, 0.0  ;;  %v80_v13 = vsel %vm74_vm1, %v78_v10, 0.0  ;;  %92 = vst [vmem:[#allocation8] sm:$0xff] %v90_v11  ;;  %p187_p5 = por %p186_p4, %p185_p3 }
  0x2e   :  { %v86_v14 = vadd.f32 %v80_v13, %v79_v12 }
  0x2f   :  { %p188_p6 = pnand %p187_p5, %p181_p2 }
  0x31   :  { %191 = shalt.err (!%p188_p6)
}
  0x32   :  { %s192_s16 = scalar_lea.hbm %s310_s3, 128 }
  0x33   :  { %p193_p7 = scmp.ne.s32.totalorder %s310_s3, %s192_s16  ;;  %p196_p8 = scmp.lt.u32.totalorder %s192_s16, %s310_s3 }
  0x35   :  { %p198_p9 = pnand %p196_p8, %p193_p7 }
  0x37   :  { %201 = shalt.err (!%p198_p9)
}
  0x38   :  { %112 = dma.vmem_to_hbm [thread:$0]  %s110_s11, 128, %s310_s3, [#allocation9]   ;;  %88 = vst [vmem:[#allocation7] sm:$0xff] %v86_v14 }
  0x39   :  { %s202_s23 = scalar_lea.vmem %s100_s12, 128  ;;  %p207_p11 = scmp.lt.s32.totalorder %s100_s12, %s100_s12 }
  0x3a   :  { %p203_p10 = scmp.ne.s32.totalorder %s100_s12, %s202_s23  ;;  %p208_p12 = scmp.lt.s32.totalorder %s202_s23, %s202_s23 }
  0x3c   :  { %p209_p13 = por %p208_p12, %p207_p11 }
  0x3e   :  { %p210_p0 = pnand %p209_p13, %p203_p10 }
  0x40   :  { %213 = shalt.err (!%p210_p0)
}
  0x41   :  { %s214_s26 = scalar_lea.hbm %s309_s2, 128 }
  0x42   :  { %p215_p1 = scmp.ne.s32.totalorder %s309_s2, %s214_s26  ;;  %p218_p2 = scmp.lt.u32.totalorder %s214_s26, %s309_s2 }
  0x44   :  { %p220_p3 = pnand %p218_p2, %p215_p1 }
  0x46   :  { %223 = shalt.err (!%p220_p3)
}
  0x47   :  { %102 = dma.vmem_to_hbm [thread:$0]  %s100_s12, 128, %s309_s2, [#allocation4]  }
  0x48   :  { %228 = dma.done.wait [#allocation4], 128  }
  0x49   :  { %229 = vsyncadd [#allocation4], 4294967168 }
  0x4a   :  { %230 = dma.done.wait [#allocation9], 128  }
  0x4b   :  { %231 = vsyncadd [#allocation9], 4294967168 }
  0x4c   :  { %119 = vsyncpa [#allocation3], 1 }
  0x4d   :  { %120 = vsyncpa [#allocation6], 1 }
  0x4e   :  { %121 = vsyncpa [#allocation4], 1 }
  0x4f   :  { %122 = vsyncpa [#allocation9], 1 }

</bundles_post_ra>
